<compile_context>
chip_gen: v7x
topology: tpu7x:2x2x1
jax: 0.10.0
libtpu: 0.0.40
codegen_flags: <defaults>
</compile_context>

<pallas_src>
import functools

import jax
import jax.numpy as jnp
from jax import lax
from jax.experimental import pallas as pl
from jax.experimental.pallas import tpu as pltpu


def _round_up(x, m):
    return ((x + m - 1) // m) * m


def _padded_plane_bytes(h, w, itemsize):
    # (8,128)-tiled VMEM footprint of one (h, w) plane.
    return _round_up(h, 8) * _round_up(max(w, 1), 128) * itemsize


def _pick_bn(n, per_sample_bytes, target_bytes=4 << 20, cap=8):
    """Largest divisor of n (<= cap) whose in+out block stays under `target_bytes`
    and which leaves at least 2 grid steps (so both v7x TensorCores get work)."""
    best = 1
    for d in range(1, min(n, cap) + 1):
        if n % d:
            continue
        if d * per_sample_bytes > target_bytes:
            continue
        if n >= 2 and n // d < 2:
            continue
        best = d
    return best


# ----------------------------------------------------------------------------- kernels


def _shift_kernel_slice(shift_ref, x_ref, o_ref, pbuf_ref, *, pad):
    """Fast path: row shift = dynamic sublane slice of an in-VMEM row-replicate-padded
    plane; column shift = exact one-hot selection matmul on the MXU."""
    bn, c, h, w = x_ref.shape
    dt = o_ref.dtype
    top = _round_up(pad, 8)            # 8-aligned offset of the interior rows in pbuf
    bstart = ((top + h) // 8) * 8      # 8-aligned start of the bottom replicate block
    tail = top + h + pad - bstart      # bottom replicate rows actually written

    # Hoisted iotas (built once per grid step, not per sample).
    q_idx = lax.broadcasted_iota(jnp.int32, (w, w), 0)   # source column q
    j_idx = lax.broadcasted_iota(jnp.int32, (w, w), 1)   # output column j
    base = pl.program_id(0) * bn

    def body(bi, carry):
        b = base + bi
        sx = shift_ref[2 * b]          # column shift in [0, 2*pad]
        sy = shift_ref[2 * b + 1]      # row    shift in [0, 2*pad]
        # Column-gather one-hot: sel[q, j] = 1 iff q == clamp(j + sx - pad, 0, w-1)
        # (the clamp implements the replicate padding for columns).
        sel_cols = (q_idx == jnp.clip(j_idx + (sx - pad), 0, w - 1)).astype(jnp.float32)

        for ci in range(c):            # C is small: static unroll
            plane = x_ref[bi, ci]      # (h, w)
            # Row-replicate-pad into VMEM scratch.  All stores use static, 8-aligned
            # row offsets; the bottom block is written first and its overlap with the
            # interior rows is overwritten by the interior store.
            pbuf_ref[ci, pl.ds(0, top), :] = jnp.broadcast_to(plane[:1, :], (top, w))
            pbuf_ref[ci, pl.ds(bstart, tail), :] = jnp.broadcast_to(
                plane[h - 1:, :], (tail, w))
            pbuf_ref[ci, pl.ds(top, h), :] = plane

        start = sy + (top - pad)       # dynamic window start inside the padded scratch
        for ci in range(c):
            rows = pbuf_ref[ci, pl.ds(start, h), :]          # (h, w) shifted rows
            out = jnp.dot(rows, sel_cols, preferred_element_type=jnp.float32)
            o_ref[bi, ci] = out.astype(dt)
        return carry

    lax.fori_loop(0, bn, body, 0)


def _shift_kernel_matmul(shift_ref, x_ref, o_ref, *, pad):
    """Fallback path: both row and column gathers as exact one-hot MXU matmuls
    (replicate padding via index clamping inside the one-hot masks)."""
    bn, c, h, w = x_ref.shape
    dt = o_ref.dtype
    i_idx = lax.broadcasted_iota(jnp.int32, (h, h), 0)   # output row i
    r_idx = lax.broadcasted_iota(jnp.int32, (h, h), 1)   # source row r
    q_idx = lax.broadcasted_iota(jnp.int32, (w, w), 0)   # source col q
    j_idx = lax.broadcasted_iota(jnp.int32, (w, w), 1)   # output col j
    base = pl.program_id(0) * bn

    def body(bi, carry):
        b = base + bi
        sx = shift_ref[2 * b]
        sy = shift_ref[2 * b + 1]
        sel_rows = (r_idx == jnp.clip(i_idx + (sy - pad), 0, h - 1)).astype(jnp.float32)
        sel_cols = (q_idx == jnp.clip(j_idx + (sx - pad), 0, w - 1)).astype(jnp.float32)
        for ci in range(c):
            plane = x_ref[bi, ci]                                   # (h, w)
            rows = jnp.dot(sel_rows, plane, preferred_element_type=jnp.float32)
            out = jnp.dot(rows, sel_cols, preferred_element_type=jnp.float32)
            o_ref[bi, ci] = out.astype(dt)
        return carry

    lax.fori_loop(0, bn, body, 0)


# ----------------------------------------------------------------------------- wrappers


@functools.partial(jax.jit, static_argnames=("pad",))
def _aug_slice(x, shifts_flat, *, pad):
    n, c, h, w = x.shape
    itemsize = jnp.dtype(x.dtype).itemsize
    per_sample = 2 * c * _padded_plane_bytes(h, w, itemsize)        # in + out per sample
    bn = _pick_bn(n, per_sample)
    scratch_rows = _round_up(pad, 8) + h + pad
    scratch_bytes = c * _padded_plane_bytes(scratch_rows, w, itemsize)
    vmem_limit = int(min(max(2 * bn * per_sample + scratch_bytes + (4 << 20),
                             16 << 20), 48 << 20))
    block = (bn, c, h, w)
    flops = 2 * n * c * h * w * w                                   # one matmul per plane
    bytes_accessed = 2 * n * c * h * w * itemsize + 8 * n

    return pl.pallas_call(
        functools.partial(_shift_kernel_slice, pad=pad),
        out_shape=jax.ShapeDtypeStruct((n, c, h, w), x.dtype),
        grid_spec=pltpu.PrefetchScalarGridSpec(
            num_scalar_prefetch=1,
            grid=(n // bn,),
            in_specs=[pl.BlockSpec(block, lambda i, s: (i, 0, 0, 0))],
            out_specs=pl.BlockSpec(block, lambda i, s: (i, 0, 0, 0)),
            scratch_shapes=[pltpu.VMEM((c, scratch_rows, w), x.dtype)],
        ),
        compiler_params=pltpu.CompilerParams(
            dimension_semantics=("parallel",),
            vmem_limit_bytes=vmem_limit),
        cost_estimate=pl.CostEstimate(
            flops=flops, transcendentals=0, bytes_accessed=bytes_accessed),
    )(shifts_flat, x)


@functools.partial(jax.jit, static_argnames=("pad",))
def _aug_matmul(x, shifts_flat, *, pad):
    n, c, h, w = x.shape
    itemsize = jnp.dtype(x.dtype).itemsize
    per_sample = 2 * c * _padded_plane_bytes(h, w, itemsize)
    bn = _pick_bn(n, per_sample)
    vmem_limit = int(min(max(2 * bn * per_sample + (4 << 20), 16 << 20), 48 << 20))
    block = (bn, c, h, w)
    flops = 2 * n * c * (h * h * w + h * w * w)
    bytes_accessed = 2 * n * c * h * w * itemsize + 8 * n

    return pl.pallas_call(
        functools.partial(_shift_kernel_matmul, pad=pad),
        out_shape=jax.ShapeDtypeStruct((n, c, h, w), x.dtype),
        grid_spec=pltpu.PrefetchScalarGridSpec(
            num_scalar_prefetch=1,
            grid=(n // bn,),
            in_specs=[pl.BlockSpec(block, lambda i, s: (i, 0, 0, 0))],
            out_specs=pl.BlockSpec(block, lambda i, s: (i, 0, 0, 0)),
        ),
        compiler_params=pltpu.CompilerParams(
            dimension_semantics=("parallel",),
            vmem_limit_bytes=vmem_limit),
        cost_estimate=pl.CostEstimate(
            flops=flops, transcendentals=0, bytes_accessed=bytes_accessed),
    )(shifts_flat, x)


_FAST_PATH_OK = None   # None = not probed yet; True/False afterwards


def random_shifts_aug(x, shifts, *, pad):
    """x: (N, C, H, W) float; shifts: (N, 2) int32 in [0, 2*pad] ([:,0]=col, [:,1]=row)."""
    global _FAST_PATH_OK
    n, c, h, w = x.shape
    assert h == w, "RandomShiftsAug requires square images"
    assert pad >= 1
    shifts_flat = jnp.asarray(shifts, jnp.int32).reshape(-1)   # flat (2N,) SMEM table

    if _FAST_PATH_OK is None:
        # Probe once: prefer the halved-FLOPs slice kernel; fall back to the proven
        # two-matmul kernel if the dynamic sublane slice is rejected on this jaxlib.
        try:
            y_fast = _aug_slice(x, shifts_flat, pad=pad)
            y_safe = _aug_matmul(x, shifts_flat, pad=pad)
            _FAST_PATH_OK = bool(jnp.array_equal(y_fast, y_safe))
            return y_fast if _FAST_PATH_OK else y_safe
        except Exception:
            _FAST_PATH_OK = False
            return _aug_matmul(x, shifts_flat, pad=pad)

    if _FAST_PATH_OK:
        return _aug_slice(x, shifts_flat, pad=pad)
    return _aug_matmul(x, shifts_flat, pad=pad)


def sample_shifts(key, n, pad):
    """Per-sample integer shifts, same distribution as torch.randint(0, 2*pad+1)."""
    # TODO(synk): torch's exact RNG stream cannot be reproduced; the distribution matches.
    return jax.random.randint(key, (n, 2), 0, 2 * pad + 1, dtype=jnp.int32)


if __name__ == "__main__":
    key = jax.random.PRNGKey(0)
    kx, ks = jax.random.split(key)

    n, c, h, w = 2, 4, 16, 16
    pad = 4

    x = jax.random.normal(kx, (n, c, h, w), jnp.float32)
    shifts = sample_shifts(ks, n, pad)

    y = random_shifts_aug(x, shifts, pad=pad)
    jax.block_until_ready(y)

    # Pure-JAX reference: replicate-pad + per-sample integer crop, which is exactly what
    # the torch grid_sample computes here (all sample points hit pixel centers).
    x_pad = jnp.pad(x, ((0, 0), (0, 0), (pad, pad), (pad, pad)), mode="edge")
    ref = jnp.stack([
        lax.dynamic_slice(
            x_pad[b], (0, int(shifts[b, 1]), int(shifts[b, 0])), (c, h, w))
        for b in range(n)
    ])

    assert y.shape == (n, c, h, w)
    assert jnp.allclose(y, ref, atol=1e-6, rtol=0.0)
    print("KERNEL_OK")
</pallas_src>

<mosaic_0001>
module attributes {stable_mosaic.version = 11 : i64} {
  func.func @_shift_kernel_slice(%arg0: i32, %arg1: memref<4xi32, #tpu.memory_space<smem>>, %arg2: memref<1x4x16x16xf32, #tpu.memory_space<vmem>>, %arg3: memref<1x4x16x16xf32, #tpu.memory_space<vmem>>, %arg4: memref<4x28x16xf32, #tpu.memory_space<vmem>>) attributes {dimension_semantics = [#tpu.dimension_semantics<parallel>], iteration_bounds = array<i64: 2>, scalar_prefetch = 1 : i64, scratch_operands = 1 : i64, tpu.core_type = #tpu.core_type<tc>, window_params = [{transform_indices = @transform_0, window_bounds = array<i64: 1, 4, 16, 16>}, {transform_indices = @transform_1, window_bounds = array<i64: 1, 4, 16, 16>}]} {
    %0 = tpu.iota {dimensions = array<i32: 0>} : vector<16x16xi32>
    %1 = tpu.iota {dimensions = array<i32: 1>} : vector<16x16xi32>
    %c1_i32 = arith.constant 1 : i32
    %2 = arith.muli %arg0, %c1_i32 : i32
    %c0_i32 = arith.constant 0 : i32
    %3 = arith.addi %2, %c0_i32 : i32
    %c2_i32 = arith.constant 2 : i32
    %4 = arith.muli %c2_i32, %3 : i32
    %5 = arith.index_cast %4 : i32 to index
    %6 = memref.load %arg1[%5] : memref<4xi32, #tpu.memory_space<smem>>
    %c2_i32_0 = arith.constant 2 : i32
    %7 = arith.muli %c2_i32_0, %3 : i32
    %c1_i32_1 = arith.constant 1 : i32
    %8 = arith.addi %7, %c1_i32_1 : i32
    %9 = arith.index_cast %8 : i32 to index
    %10 = memref.load %arg1[%9] : memref<4xi32, #tpu.memory_space<smem>>
    %c4_i32 = arith.constant 4 : i32
    %11 = arith.subi %6, %c4_i32 : i32
    %12 = vector.broadcast %11 : i32 to vector<16x16xi32>
    %13 = arith.addi %1, %12 : vector<16x16xi32>
    %c0_i32_2 = arith.constant 0 : i32
    %c15_i32 = arith.constant 15 : i32
    %14 = vector.broadcast %c0_i32_2 : i32 to vector<16x16xi32>
    %15 = arith.maxsi %14, %13 : vector<16x16xi32>
    %16 = vector.broadcast %c15_i32 : i32 to vector<16x16xi32>
    %17 = arith.minsi %16, %15 : vector<16x16xi32>
    %18 = arith.cmpi eq, %0, %17 : vector<16x16xi32>
    %19 = arith.extui %18 : vector<16x16xi1> to vector<16x16xi32>
    %20 = arith.sitofp %19 : vector<16x16xi32> to vector<16x16xf32>
    %21 = arith.index_cast %c0_i32 : i32 to index
    %c0 = arith.constant 0 : index
    %c0_3 = arith.constant 0 : index
    %c0_4 = arith.constant 0 : index
    %22 = vector.load %arg2[%21, %c0, %c0_3, %c0_4] : memref<1x4x16x16xf32, #tpu.memory_space<vmem>>, vector<1x1x16x16xf32>
    %23 = vector.shape_cast %22 : vector<1x1x16x16xf32> to vector<16x16xf32>
    %24 = vector.extract_strided_slice %23 {offsets = [0, 0], sizes = [1, 16], strides = [1, 1]} : vector<16x16xf32> to vector<1x16xf32>
    %25 = vector.shape_cast %24 : vector<1x16xf32> to vector<1x16xf32>
    %26 = vector.broadcast %25 : vector<1x16xf32> to vector<8x16xf32>
    %c0_5 = arith.constant 0 : index
    %c0_6 = arith.constant 0 : index
    %c0_7 = arith.constant 0 : index
    %27 = vector.load %arg4[%c0_5, %c0_6, %c0_7] : memref<4x28x16xf32, #tpu.memory_space<vmem>>, vector<1x8x16xf32>
    %28 = vector.shape_cast %27 : vector<1x8x16xf32> to vector<8x16xf32>
    %29 = vector.shape_cast %26 : vector<8x16xf32> to vector<1x8x16xf32>
    tpu.vector_store %arg4[%c0_5, %c0_6, %c0_7], %29 {strides = array<i32>} : memref<4x28x16xf32, #tpu.memory_space<vmem>>, vector<1x8x16xf32>,
    %30 = vector.extract_strided_slice %23 {offsets = [15, 0], sizes = [1, 16], strides = [1, 1]} : vector<16x16xf32> to vector<1x16xf32>
    %31 = vector.shape_cast %30 : vector<1x16xf32> to vector<1x16xf32>
    %32 = vector.broadcast %31 : vector<1x16xf32> to vector<4x16xf32>
    %c0_8 = arith.constant 0 : index
    %c24 = arith.constant 24 : index
    %c0_9 = arith.constant 0 : index
    %33 = vector.load %arg4[%c0_8, %c24, %c0_9] : memref<4x28x16xf32, #tpu.memory_space<vmem>>, vector<1x4x16xf32>
    %34 = vector.shape_cast %33 : vector<1x4x16xf32> to vector<4x16xf32>
    %35 = vector.shape_cast %32 : vector<4x16xf32> to vector<1x4x16xf32>
    tpu.vector_store %arg4[%c0_8, %c24, %c0_9], %35 {strides = array<i32>} : memref<4x28x16xf32, #tpu.memory_space<vmem>>, vector<1x4x16xf32>,
    %c0_10 = arith.constant 0 : index
    %c8 = arith.constant 8 : index
    %c0_11 = arith.constant 0 : index
    %36 = vector.load %arg4[%c0_10, %c8, %c0_11] : memref<4x28x16xf32, #tpu.memory_space<vmem>>, vector<1x16x16xf32>
    %37 = vector.shape_cast %36 : vector<1x16x16xf32> to vector<16x16xf32>
    %38 = vector.shape_cast %23 : vector<16x16xf32> to vector<1x16x16xf32>
    tpu.vector_store %arg4[%c0_10, %c8, %c0_11], %38 {strides = array<i32>} : memref<4x28x16xf32, #tpu.memory_space<vmem>>, vector<1x16x16xf32>,
    %39 = arith.index_cast %c0_i32 : i32 to index
    %c1 = arith.constant 1 : index
    %c0_12 = arith.constant 0 : index
    %c0_13 = arith.constant 0 : index
    %40 = vector.load %arg2[%39, %c1, %c0_12, %c0_13] : memref<1x4x16x16xf32, #tpu.memory_space<vmem>>, vector<1x1x16x16xf32>
    %41 = vector.shape_cast %40 : vector<1x1x16x16xf32> to vector<16x16xf32>
    %42 = vector.extract_strided_slice %41 {offsets = [0, 0], sizes = [1, 16], strides = [1, 1]} : vector<16x16xf32> to vector<1x16xf32>
    %43 = vector.shape_cast %42 : vector<1x16xf32> to vector<1x16xf32>
    %44 = vector.broadcast %43 : vector<1x16xf32> to vector<8x16xf32>
    %c1_14 = arith.constant 1 : index
    %c0_15 = arith.constant 0 : index
    %c0_16 = arith.constant 0 : index
    %45 = vector.load %arg4[%c1_14, %c0_15, %c0_16] : memref<4x28x16xf32, #tpu.memory_space<vmem>>, vector<1x8x16xf32>
    %46 = vector.shape_cast %45 : vector<1x8x16xf32> to vector<8x16xf32>
    %47 = vector.shape_cast %44 : vector<8x16xf32> to vector<1x8x16xf32>
    tpu.vector_store %arg4[%c1_14, %c0_15, %c0_16], %47 {strides = array<i32>} : memref<4x28x16xf32, #tpu.memory_space<vmem>>, vector<1x8x16xf32>,
    %48 = vector.extract_strided_slice %41 {offsets = [15, 0], sizes = [1, 16], strides = [1, 1]} : vector<16x16xf32> to vector<1x16xf32>
    %49 = vector.shape_cast %48 : vector<1x16xf32> to vector<1x16xf32>
    %50 = vector.broadcast %49 : vector<1x16xf32> to vector<4x16xf32>
    %c1_17 = arith.constant 1 : index
    %c24_18 = arith.constant 24 : index
    %c0_19 = arith.constant 0 : index
    %51 = vector.load %arg4[%c1_17, %c24_18, %c0_19] : memref<4x28x16xf32, #tpu.memory_space<vmem>>, vector<1x4x16xf32>
    %52 = vector.shape_cast %51 : vector<1x4x16xf32> to vector<4x16xf32>
    %53 = vector.shape_cast %50 : vector<4x16xf32> to vector<1x4x16xf32>
    tpu.vector_store %arg4[%c1_17, %c24_18, %c0_19], %53 {strides = array<i32>} : memref<4x28x16xf32, #tpu.memory_space<vmem>>, vector<1x4x16xf32>,
    %c1_20 = arith.constant 1 : index
    %c8_21 = arith.constant 8 : index
    %c0_22 = arith.constant 0 : index
    %54 = vector.load %arg4[%c1_20, %c8_21, %c0_22] : memref<4x28x16xf32, #tpu.memory_space<vmem>>, vector<1x16x16xf32>
    %55 = vector.shape_cast %54 : vector<1x16x16xf32> to vector<16x16xf32>
    %56 = vector.shape_cast %41 : vector<16x16xf32> to vector<1x16x16xf32>
    tpu.vector_store %arg4[%c1_20, %c8_21, %c0_22], %56 {strides = array<i32>} : memref<4x28x16xf32, #tpu.memory_space<vmem>>, vector<1x16x16xf32>,
    %57 = arith.index_cast %c0_i32 : i32 to index
    %c2 = arith.constant 2 : index
    %c0_23 = arith.constant 0 : index
    %c0_24 = arith.constant 0 : index
    %58 = vector.load %arg2[%57, %c2, %c0_23, %c0_24] : memref<1x4x16x16xf32, #tpu.memory_space<vmem>>, vector<1x1x16x16xf32>
    %59 = vector.shape_cast %58 : vector<1x1x16x16xf32> to vector<16x16xf32>
    %60 = vector.extract_strided_slice %59 {offsets = [0, 0], sizes = [1, 16], strides = [1, 1]} : vector<16x16xf32> to vector<1x16xf32>
    %61 = vector.shape_cast %60 : vector<1x16xf32> to vector<1x16xf32>
    %62 = vector.broadcast %61 : vector<1x16xf32> to vector<8x16xf32>
    %c2_25 = arith.constant 2 : index
    %c0_26 = arith.constant 0 : index
    %c0_27 = arith.constant 0 : index
    %63 = vector.load %arg4[%c2_25, %c0_26, %c0_27] : memref<4x28x16xf32, #tpu.memory_space<vmem>>, vector<1x8x16xf32>
    %64 = vector.shape_cast %63 : vector<1x8x16xf32> to vector<8x16xf32>
    %65 = vector.shape_cast %62 : vector<8x16xf32> to vector<1x8x16xf32>
    tpu.vector_store %arg4[%c2_25, %c0_26, %c0_27], %65 {strides = array<i32>} : memref<4x28x16xf32, #tpu.memory_space<vmem>>, vector<1x8x16xf32>,
    %66 = vector.extract_strided_slice %59 {offsets = [15, 0], sizes = [1, 16], strides = [1, 1]} : vector<16x16xf32> to vector<1x16xf32>
    %67 = vector.shape_cast %66 : vector<1x16xf32> to vector<1x16xf32>
    %68 = vector.broadcast %67 : vector<1x16xf32> to vector<4x16xf32>
    %c2_28 = arith.constant 2 : index
    %c24_29 = arith.constant 24 : index
    %c0_30 = arith.constant 0 : index
    %69 = vector.load %arg4[%c2_28, %c24_29, %c0_30] : memref<4x28x16xf32, #tpu.memory_space<vmem>>, vector<1x4x16xf32>
    %70 = vector.shape_cast %69 : vector<1x4x16xf32> to vector<4x16xf32>
    %71 = vector.shape_cast %68 : vector<4x16xf32> to vector<1x4x16xf32>
    tpu.vector_store %arg4[%c2_28, %c24_29, %c0_30], %71 {strides = array<i32>} : memref<4x28x16xf32, #tpu.memory_space<vmem>>, vector<1x4x16xf32>,
    %c2_31 = arith.constant 2 : index
    %c8_32 = arith.constant 8 : index
    %c0_33 = arith.constant 0 : index
    %72 = vector.load %arg4[%c2_31, %c8_32, %c0_33] : memref<4x28x16xf32, #tpu.memory_space<vmem>>, vector<1x16x16xf32>
    %73 = vector.shape_cast %72 : vector<1x16x16xf32> to vector<16x16xf32>
    %74 = vector.shape_cast %59 : vector<16x16xf32> to vector<1x16x16xf32>
    tpu.vector_store %arg4[%c2_31, %c8_32, %c0_33], %74 {strides = array<i32>} : memref<4x28x16xf32, #tpu.memory_space<vmem>>, vector<1x16x16xf32>,
    %75 = arith.index_cast %c0_i32 : i32 to index
    %c3 = arith.constant 3 : index
    %c0_34 = arith.constant 0 : index
    %c0_35 = arith.constant 0 : index
    %76 = vector.load %arg2[%75, %c3, %c0_34, %c0_35] : memref<1x4x16x16xf32, #tpu.memory_space<vmem>>, vector<1x1x16x16xf32>
    %77 = vector.shape_cast %76 : vector<1x1x16x16xf32> to vector<16x16xf32>
    %78 = vector.extract_strided_slice %77 {offsets = [0, 0], sizes = [1, 16], strides = [1, 1]} : vector<16x16xf32> to vector<1x16xf32>
    %79 = vector.shape_cast %78 : vector<1x16xf32> to vector<1x16xf32>
    %80 = vector.broadcast %79 : vector<1x16xf32> to vector<8x16xf32>
    %c3_36 = arith.constant 3 : index
    %c0_37 = arith.constant 0 : index
    %c0_38 = arith.constant 0 : index
    %81 = vector.load %arg4[%c3_36, %c0_37, %c0_38] : memref<4x28x16xf32, #tpu.memory_space<vmem>>, vector<1x8x16xf32>
    %82 = vector.shape_cast %81 : vector<1x8x16xf32> to vector<8x16xf32>
    %83 = vector.shape_cast %80 : vector<8x16xf32> to vector<1x8x16xf32>
    tpu.vector_store %arg4[%c3_36, %c0_37, %c0_38], %83 {strides = array<i32>} : memref<4x28x16xf32, #tpu.memory_space<vmem>>, vector<1x8x16xf32>,
    %84 = vector.extract_strided_slice %77 {offsets = [15, 0], sizes = [1, 16], strides = [1, 1]} : vector<16x16xf32> to vector<1x16xf32>
    %85 = vector.shape_cast %84 : vector<1x16xf32> to vector<1x16xf32>
    %86 = vector.broadcast %85 : vector<1x16xf32> to vector<4x16xf32>
    %c3_39 = arith.constant 3 : index
    %c24_40 = arith.constant 24 : index
    %c0_41 = arith.constant 0 : index
    %87 = vector.load %arg4[%c3_39, %c24_40, %c0_41] : memref<4x28x16xf32, #tpu.memory_space<vmem>>, vector<1x4x16xf32>
    %88 = vector.shape_cast %87 : vector<1x4x16xf32> to vector<4x16xf32>
    %89 = vector.shape_cast %86 : vector<4x16xf32> to vector<1x4x16xf32>
    tpu.vector_store %arg4[%c3_39, %c24_40, %c0_41], %89 {strides = array<i32>} : memref<4x28x16xf32, #tpu.memory_space<vmem>>, vector<1x4x16xf32>,
    %c3_42 = arith.constant 3 : index
    %c8_43 = arith.constant 8 : index
    %c0_44 = arith.constant 0 : index
    %90 = vector.load %arg4[%c3_42, %c8_43, %c0_44] : memref<4x28x16xf32, #tpu.memory_space<vmem>>, vector<1x16x16xf32>
    %91 = vector.shape_cast %90 : vector<1x16x16xf32> to vector<16x16xf32>
    %92 = vector.shape_cast %77 : vector<16x16xf32> to vector<1x16x16xf32>
    tpu.vector_store %arg4[%c3_42, %c8_43, %c0_44], %92 {strides = array<i32>} : memref<4x28x16xf32, #tpu.memory_space<vmem>>, vector<1x16x16xf32>,
    %c4_i32_45 = arith.constant 4 : i32
    %93 = arith.addi %10, %c4_i32_45 : i32
    %c0_46 = arith.constant 0 : index
    %94 = arith.index_cast %93 : i32 to index
    %c0_47 = arith.constant 0 : index
    %95 = vector.load %arg4[%c0_46, %94, %c0_47] : memref<4x28x16xf32, #tpu.memory_space<vmem>>, vector<1x16x16xf32>
    %96 = vector.shape_cast %95 : vector<1x16x16xf32> to vector<16x16xf32>
    %cst = arith.constant dense<0.000000e+00> : vector<16x16xf32>
    %97 = tpu.matmul %96, %20, %cst {dimension_numbers = #tpu.dot_dimension_numbers<[1], [0], [0], [1], [0, 0, 1, 1], [], []>} : vector<16x16xf32>, vector<16x16xf32>, vector<16x16xf32> -> vector<16x16xf32>
    %98 = arith.index_cast %c0_i32 : i32 to index
    %c0_48 = arith.constant 0 : index
    %c0_49 = arith.constant 0 : index
    %c0_50 = arith.constant 0 : index
    %99 = vector.load %arg3[%98, %c0_48, %c0_49, %c0_50] : memref<1x4x16x16xf32, #tpu.memory_space<vmem>>, vector<1x1x16x16xf32>
    %100 = vector.shape_cast %99 : vector<1x1x16x16xf32> to vector<16x16xf32>
    %101 = vector.shape_cast %97 : vector<16x16xf32> to vector<1x1x16x16xf32>
    tpu.vector_store %arg3[%98, %c0_48, %c0_49, %c0_50], %101 {strides = array<i32>} : memref<1x4x16x16xf32, #tpu.memory_space<vmem>>, vector<1x1x16x16xf32>,
    %c1_51 = arith.constant 1 : index
    %102 = arith.index_cast %93 : i32 to index
    %c0_52 = arith.constant 0 : index
    %103 = vector.load %arg4[%c1_51, %102, %c0_52] : memref<4x28x16xf32, #tpu.memory_space<vmem>>, vector<1x16x16xf32>
    %104 = vector.shape_cast %103 : vector<1x16x16xf32> to vector<16x16xf32>
    %cst_53 = arith.constant dense<0.000000e+00> : vector<16x16xf32>
    %105 = tpu.matmul %104, %20, %cst_53 {dimension_numbers = #tpu.dot_dimension_numbers<[1], [0], [0], [1], [0, 0, 1, 1], [], []>} : vector<16x16xf32>, vector<16x16xf32>, vector<16x16xf32> -> vector<16x16xf32>
    %106 = arith.index_cast %c0_i32 : i32 to index
    %c1_54 = arith.constant 1 : index
    %c0_55 = arith.constant 0 : index
    %c0_56 = arith.constant 0 : index
    %107 = vector.load %arg3[%106, %c1_54, %c0_55, %c0_56] : memref<1x4x16x16xf32, #tpu.memory_space<vmem>>, vector<1x1x16x16xf32>
    %108 = vector.shape_cast %107 : vector<1x1x16x16xf32> to vector<16x16xf32>
    %109 = vector.shape_cast %105 : vector<16x16xf32> to vector<1x1x16x16xf32>
    tpu.vector_store %arg3[%106, %c1_54, %c0_55, %c0_56], %109 {strides = array<i32>} : memref<1x4x16x16xf32, #tpu.memory_space<vmem>>, vector<1x1x16x16xf32>,
    %c2_57 = arith.constant 2 : index
    %110 = arith.index_cast %93 : i32 to index
    %c0_58 = arith.constant 0 : index
    %111 = vector.load %arg4[%c2_57, %110, %c0_58] : memref<4x28x16xf32, #tpu.memory_space<vmem>>, vector<1x16x16xf32>
    %112 = vector.shape_cast %111 : vector<1x16x16xf32> to vector<16x16xf32>
    %cst_59 = arith.constant dense<0.000000e+00> : vector<16x16xf32>
    %113 = tpu.matmul %112, %20, %cst_59 {dimension_numbers = #tpu.dot_dimension_numbers<[1], [0], [0], [1], [0, 0, 1, 1], [], []>} : vector<16x16xf32>, vector<16x16xf32>, vector<16x16xf32> -> vector<16x16xf32>
    %114 = arith.index_cast %c0_i32 : i32 to index
    %c2_60 = arith.constant 2 : index
    %c0_61 = arith.constant 0 : index
    %c0_62 = arith.constant 0 : index
    %115 = vector.load %arg3[%114, %c2_60, %c0_61, %c0_62] : memref<1x4x16x16xf32, #tpu.memory_space<vmem>>, vector<1x1x16x16xf32>
    %116 = vector.shape_cast %115 : vector<1x1x16x16xf32> to vector<16x16xf32>
    %117 = vector.shape_cast %113 : vector<16x16xf32> to vector<1x1x16x16xf32>
    tpu.vector_store %arg3[%114, %c2_60, %c0_61, %c0_62], %117 {strides = array<i32>} : memref<1x4x16x16xf32, #tpu.memory_space<vmem>>, vector<1x1x16x16xf32>,
    %c3_63 = arith.constant 3 : index
    %118 = arith.index_cast %93 : i32 to index
    %c0_64 = arith.constant 0 : index
    %119 = vector.load %arg4[%c3_63, %118, %c0_64] : memref<4x28x16xf32, #tpu.memory_space<vmem>>, vector<1x16x16xf32>
    %120 = vector.shape_cast %119 : vector<1x16x16xf32> to vector<16x16xf32>
    %cst_65 = arith.constant dense<0.000000e+00> : vector<16x16xf32>
    %121 = tpu.matmul %120, %20, %cst_65 {dimension_numbers = #tpu.dot_dimension_numbers<[1], [0], [0], [1], [0, 0, 1, 1], [], []>} : vector<16x16xf32>, vector<16x16xf32>, vector<16x16xf32> -> vector<16x16xf32>
    %122 = arith.index_cast %c0_i32 : i32 to index
    %c3_66 = arith.constant 3 : index
    %c0_67 = arith.constant 0 : index
    %c0_68 = arith.constant 0 : index
    %123 = vector.load %arg3[%122, %c3_66, %c0_67, %c0_68] : memref<1x4x16x16xf32, #tpu.memory_space<vmem>>, vector<1x1x16x16xf32>
    %124 = vector.shape_cast %123 : vector<1x1x16x16xf32> to vector<16x16xf32>
    %125 = vector.shape_cast %121 : vector<16x16xf32> to vector<1x1x16x16xf32>
    tpu.vector_store %arg3[%122, %c3_66, %c0_67, %c0_68], %125 {strides = array<i32>} : memref<1x4x16x16xf32, #tpu.memory_space<vmem>>, vector<1x1x16x16xf32>,
    %c1_i32_69 = arith.constant 1 : i32
    return
  }
  func.func @transform_0(%arg0: i32, %arg1: memref<4xi32, #tpu.memory_space<smem>>) -> (i32, i32, i32, i32) {
    %c0_i32 = arith.constant 0 : i32
    %c0_i32_0 = arith.constant 0 : i32
    %c0_i32_1 = arith.constant 0 : i32
    %c0_i32_2 = arith.constant 0 : i32
    return %arg0, %c0_i32, %c0_i32_0, %c0_i32_1 : i32, i32, i32, i32
  }
  func.func @transform_1(%arg0: i32, %arg1: memref<4xi32, #tpu.memory_space<smem>>) -> (i32, i32, i32, i32) {
    %c0_i32 = arith.constant 0 : i32
    %c0_i32_0 = arith.constant 0 : i32
    %c0_i32_1 = arith.constant 0 : i32
    %c0_i32_2 = arith.constant 0 : i32
    return %arg0, %c0_i32, %c0_i32_0, %c0_i32_1 : i32, i32, i32, i32
  }
}

module attributes {stable_mosaic.version = 11 : i64} {
  func.func @_shift_kernel_matmul(%arg0: i32, %arg1: memref<4xi32, #tpu.memory_space<smem>>, %arg2: memref<1x4x16x16xf32, #tpu.memory_space<vmem>>, %arg3: memref<1x4x16x16xf32, #tpu.memory_space<vmem>>) attributes {dimension_semantics = [#tpu.dimension_semantics<parallel>], iteration_bounds = array<i64: 2>, scalar_prefetch = 1 : i64, scratch_operands = 0 : i64, tpu.core_type = #tpu.core_type<tc>, window_params = [{transform_indices = @transform_0, window_bounds = array<i64: 1, 4, 16, 16>}, {transform_indices = @transform_1, window_bounds = array<i64: 1, 4, 16, 16>}]} {
    %0 = tpu.iota {dimensions = array<i32: 0>} : vector<16x16xi32>
    %1 = tpu.iota {dimensions = array<i32: 1>} : vector<16x16xi32>
    %2 = tpu.iota {dimensions = array<i32: 0>} : vector<16x16xi32>
    %3 = tpu.iota {dimensions = array<i32: 1>} : vector<16x16xi32>
    %c1_i32 = arith.constant 1 : i32
    %4 = arith.muli %arg0, %c1_i32 : i32
    %c0_i32 = arith.constant 0 : i32
    %5 = arith.addi %4, %c0_i32 : i32
    %c2_i32 = arith.constant 2 : i32
    %6 = arith.muli %c2_i32, %5 : i32
    %7 = arith.index_cast %6 : i32 to index
    %8 = memref.load %arg1[%7] : memref<4xi32, #tpu.memory_space<smem>>
    %c2_i32_0 = arith.constant 2 : i32
    %9 = arith.muli %c2_i32_0, %5 : i32
    %c1_i32_1 = arith.constant 1 : i32
    %10 = arith.addi %9, %c1_i32_1 : i32
    %11 = arith.index_cast %10 : i32 to index
    %12 = memref.load %arg1[%11] : memref<4xi32, #tpu.memory_space<smem>>
    %c4_i32 = arith.constant 4 : i32
    %13 = arith.subi %12, %c4_i32 : i32
    %14 = vector.broadcast %13 : i32 to vector<16x16xi32>
    %15 = arith.addi %0, %14 : vector<16x16xi32>
    %c0_i32_2 = arith.constant 0 : i32
    %c15_i32 = arith.constant 15 : i32
    %16 = vector.broadcast %c0_i32_2 : i32 to vector<16x16xi32>
    %17 = arith.maxsi %16, %15 : vector<16x16xi32>
    %18 = vector.broadcast %c15_i32 : i32 to vector<16x16xi32>
    %19 = arith.minsi %18, %17 : vector<16x16xi32>
    %20 = arith.cmpi eq, %1, %19 : vector<16x16xi32>
    %21 = arith.extui %20 : vector<16x16xi1> to vector<16x16xi32>
    %22 = arith.sitofp %21 : vector<16x16xi32> to vector<16x16xf32>
    %c4_i32_3 = arith.constant 4 : i32
    %23 = arith.subi %8, %c4_i32_3 : i32
    %24 = vector.broadcast %23 : i32 to vector<16x16xi32>
    %25 = arith.addi %3, %24 : vector<16x16xi32>
    %c0_i32_4 = arith.constant 0 : i32
    %c15_i32_5 = arith.constant 15 : i32
    %26 = vector.broadcast %c0_i32_4 : i32 to vector<16x16xi32>
    %27 = arith.maxsi %26, %25 : vector<16x16xi32>
    %28 = vector.broadcast %c15_i32_5 : i32 to vector<16x16xi32>
    %29 = arith.minsi %28, %27 : vector<16x16xi32>
    %30 = arith.cmpi eq, %2, %29 : vector<16x16xi32>
    %31 = arith.extui %30 : vector<16x16xi1> to vector<16x16xi32>
    %32 = arith.sitofp %31 : vector<16x16xi32> to vector<16x16xf32>
    %33 = arith.index_cast %c0_i32 : i32 to index
    %c0 = arith.constant 0 : index
    %c0_6 = arith.constant 0 : index
    %c0_7 = arith.constant 0 : index
    %34 = vector.load %arg2[%33, %c0, %c0_6, %c0_7] : memref<1x4x16x16xf32, #tpu.memory_space<vmem>>, vector<1x1x16x16xf32>
    %35 = vector.shape_cast %34 : vector<1x1x16x16xf32> to vector<16x16xf32>
    %cst = arith.constant dense<0.000000e+00> : vector<16x16xf32>
    %36 = tpu.matmul %22, %35, %cst {dimension_numbers = #tpu.dot_dimension_numbers<[1], [0], [0], [1], [0, 0, 1, 1], [], []>} : vector<16x16xf32>, vector<16x16xf32>, vector<16x16xf32> -> vector<16x16xf32>
    %cst_8 = arith.constant dense<0.000000e+00> : vector<16x16xf32>
    %37 = tpu.matmul %36, %32, %cst_8 {dimension_numbers = #tpu.dot_dimension_numbers<[1], [0], [0], [1], [0, 0, 1, 1], [], []>} : vector<16x16xf32>, vector<16x16xf32>, vector<16x16xf32> -> vector<16x16xf32>
    %38 = arith.index_cast %c0_i32 : i32 to index
    %c0_9 = arith.constant 0 : index
    %c0_10 = arith.constant 0 : index
    %c0_11 = arith.constant 0 : index
    %39 = vector.load %arg3[%38, %c0_9, %c0_10, %c0_11] : memref<1x4x16x16xf32, #tpu.memory_space<vmem>>, vector<1x1x16x16xf32>
    %40 = vector.shape_cast %39 : vector<1x1x16x16xf32> to vector<16x16xf32>
    %41 = vector.shape_cast %37 : vector<16x16xf32> to vector<1x1x16x16xf32>
    tpu.vector_store %arg3[%38, %c0_9, %c0_10, %c0_11], %41 {strides = array<i32>} : memref<1x4x16x16xf32, #tpu.memory_space<vmem>>, vector<1x1x16x16xf32>,
    %42 = arith.index_cast %c0_i32 : i32 to index
    %c1 = arith.constant 1 : index
    %c0_12 = arith.constant 0 : index
    %c0_13 = arith.constant 0 : index
    %43 = vector.load %arg2[%42, %c1, %c0_12, %c0_13] : memref<1x4x16x16xf32, #tpu.memory_space<vmem>>, vector<1x1x16x16xf32>
    %44 = vector.shape_cast %43 : vector<1x1x16x16xf32> to vector<16x16xf32>
    %cst_14 = arith.constant dense<0.000000e+00> : vector<16x16xf32>
    %45 = tpu.matmul %22, %44, %cst_14 {dimension_numbers = #tpu.dot_dimension_numbers<[1], [0], [0], [1], [0, 0, 1, 1], [], []>} : vector<16x16xf32>, vector<16x16xf32>, vector<16x16xf32> -> vector<16x16xf32>
    %cst_15 = arith.constant dense<0.000000e+00> : vector<16x16xf32>
    %46 = tpu.matmul %45, %32, %cst_15 {dimension_numbers = #tpu.dot_dimension_numbers<[1], [0], [0], [1], [0, 0, 1, 1], [], []>} : vector<16x16xf32>, vector<16x16xf32>, vector<16x16xf32> -> vector<16x16xf32>
    %47 = arith.index_cast %c0_i32 : i32 to index
    %c1_16 = arith.constant 1 : index
    %c0_17 = arith.constant 0 : index
    %c0_18 = arith.constant 0 : index
    %48 = vector.load %arg3[%47, %c1_16, %c0_17, %c0_18] : memref<1x4x16x16xf32, #tpu.memory_space<vmem>>, vector<1x1x16x16xf32>
    %49 = vector.shape_cast %48 : vector<1x1x16x16xf32> to vector<16x16xf32>
    %50 = vector.shape_cast %46 : vector<16x16xf32> to vector<1x1x16x16xf32>
    tpu.vector_store %arg3[%47, %c1_16, %c0_17, %c0_18], %50 {strides = array<i32>} : memref<1x4x16x16xf32, #tpu.memory_space<vmem>>, vector<1x1x16x16xf32>,
    %51 = arith.index_cast %c0_i32 : i32 to index
    %c2 = arith.constant 2 : index
    %c0_19 = arith.constant 0 : index
    %c0_20 = arith.constant 0 : index
    %52 = vector.load %arg2[%51, %c2, %c0_19, %c0_20] : memref<1x4x16x16xf32, #tpu.memory_space<vmem>>, vector<1x1x16x16xf32>
    %53 = vector.shape_cast %52 : vector<1x1x16x16xf32> to vector<16x16xf32>
    %cst_21 = arith.constant dense<0.000000e+00> : vector<16x16xf32>
    %54 = tpu.matmul %22, %53, %cst_21 {dimension_numbers = #tpu.dot_dimension_numbers<[1], [0], [0], [1], [0, 0, 1, 1], [], []>} : vector<16x16xf32>, vector<16x16xf32>, vector<16x16xf32> -> vector<16x16xf32>
    %cst_22 = arith.constant dense<0.000000e+00> : vector<16x16xf32>
    %55 = tpu.matmul %54, %32, %cst_22 {dimension_numbers = #tpu.dot_dimension_numbers<[1], [0], [0], [1], [0, 0, 1, 1], [], []>} : vector<16x16xf32>, vector<16x16xf32>, vector<16x16xf32> -> vector<16x16xf32>
    %56 = arith.index_cast %c0_i32 : i32 to index
    %c2_23 = arith.constant 2 : index
    %c0_24 = arith.constant 0 : index
    %c0_25 = arith.constant 0 : index
    %57 = vector.load %arg3[%56, %c2_23, %c0_24, %c0_25] : memref<1x4x16x16xf32, #tpu.memory_space<vmem>>, vector<1x1x16x16xf32>
    %58 = vector.shape_cast %57 : vector<1x1x16x16xf32> to vector<16x16xf32>
    %59 = vector.shape_cast %55 : vector<16x16xf32> to vector<1x1x16x16xf32>
    tpu.vector_store %arg3[%56, %c2_23, %c0_24, %c0_25], %59 {strides = array<i32>} : memref<1x4x16x16xf32, #tpu.memory_space<vmem>>, vector<1x1x16x16xf32>,
    %60 = arith.index_cast %c0_i32 : i32 to index
    %c3 = arith.constant 3 : index
    %c0_26 = arith.constant 0 : index
    %c0_27 = arith.constant 0 : index
    %61 = vector.load %arg2[%60, %c3, %c0_26, %c0_27] : memref<1x4x16x16xf32, #tpu.memory_space<vmem>>, vector<1x1x16x16xf32>
    %62 = vector.shape_cast %61 : vector<1x1x16x16xf32> to vector<16x16xf32>
    %cst_28 = arith.constant dense<0.000000e+00> : vector<16x16xf32>
    %63 = tpu.matmul %22, %62, %cst_28 {dimension_numbers = #tpu.dot_dimension_numbers<[1], [0], [0], [1], [0, 0, 1, 1], [], []>} : vector<16x16xf32>, vector<16x16xf32>, vector<16x16xf32> -> vector<16x16xf32>
    %cst_29 = arith.constant dense<0.000000e+00> : vector<16x16xf32>
    %64 = tpu.matmul %63, %32, %cst_29 {dimension_numbers = #tpu.dot_dimension_numbers<[1], [0], [0], [1], [0, 0, 1, 1], [], []>} : vector<16x16xf32>, vector<16x16xf32>, vector<16x16xf32> -> vector<16x16xf32>
    %65 = arith.index_cast %c0_i32 : i32 to index
    %c3_30 = arith.constant 3 : index
    %c0_31 = arith.constant 0 : index
    %c0_32 = arith.constant 0 : index
    %66 = vector.load %arg3[%65, %c3_30, %c0_31, %c0_32] : memref<1x4x16x16xf32, #tpu.memory_space<vmem>>, vector<1x1x16x16xf32>
    %67 = vector.shape_cast %66 : vector<1x1x16x16xf32> to vector<16x16xf32>
    %68 = vector.shape_cast %64 : vector<16x16xf32> to vector<1x1x16x16xf32>
    tpu.vector_store %arg3[%65, %c3_30, %c0_31, %c0_32], %68 {strides = array<i32>} : memref<1x4x16x16xf32, #tpu.memory_space<vmem>>, vector<1x1x16x16xf32>,
    %c1_i32_33 = arith.constant 1 : i32
    return
  }
  func.func @transform_0(%arg0: i32, %arg1: memref<4xi32, #tpu.memory_space<smem>>) -> (i32, i32, i32, i32) {
    %c0_i32 = arith.constant 0 : i32
    %c0_i32_0 = arith.constant 0 : i32
    %c0_i32_1 = arith.constant 0 : i32
    %c0_i32_2 = arith.constant 0 : i32
    return %arg0, %c0_i32, %c0_i32_0, %c0_i32_1 : i32, i32, i32, i32
  }
  func.func @transform_1(%arg0: i32, %arg1: memref<4xi32, #tpu.memory_space<smem>>) -> (i32, i32, i32, i32) {
    %c0_i32 = arith.constant 0 : i32
    %c0_i32_0 = arith.constant 0 : i32
    %c0_i32_1 = arith.constant 0 : i32
    %c0_i32_2 = arith.constant 0 : i32
    return %arg0, %c0_i32, %c0_i32_0, %c0_i32_1 : i32, i32, i32, i32
  }
}

</mosaic_0001>

<bundles_post_ra>
// kernel: _aug_slice.1
= control target key start
LH: loop header
LB: loop body
LE: loop exit
PB: predicated region body
PF: predicated region fallthrough
CT: control target
= control target key end

     0   :  { %s1212_s0 = inlined_call_operand.vmem [shape: s32[4], index: 0, kind: input, shape index: {}]   ;;  %s1213_s1 = inlined_call_operand.hbm [shape: f32[2,4,16,16], index: 1, kind: input, shape index: {}]   ;;  %s1214_s2 = inlined_call_operand.hbm [shape: f32[2,4,16,16], index: 2, kind: output, shape index: {}]  }
   0x1   :  { %s7_s11 = sshll.u32 %s1212_s0, 4  ;;  %s8_s11 = int_to_ptr.vmem [resolvable:$true] %s7_s11 }
   0x2   :  { %s842_s12 = scalar_lea.vmem %s8_s11, 16  ;;  %p847_p1 = scmp.lt.s32.totalorder %s8_s11, %s8_s11 }
   0x3   :  { %p843_p0 = scmp.ne.s32.totalorder %s8_s11, %s842_s12  ;;  %p848_p2 = scmp.lt.s32.totalorder %s842_s12, %s842_s12 }
   0x5   :  { %p849_p3 = por %p848_p2, %p847_p1 }
   0x7   :  { %p850_p4 = pnand %p849_p3, %p843_p0 }
   0x9   :  { %853 = shalt.err (!%p850_p4)  }
   0xa   :  { %s954_s13 = smov [#allocation4]  }
   0xb   :  { %10 = dma.vmem_to_smem %s8_s11, 16, %s954_s13, [#allocation3] }
   0xc   :  { %928 = dma.done.wait [#allocation3], 16 }
   0xd   :  { %929 = vsyncadd [#allocation3], 4294967280 }
   0xe   :  { %12 = sfence }
   0xf   :  { %13 = vsyncpa [#allocation6], 0 }
  0x10   :  { %15 = vsyncpa [#allocation6 + $0x1], 0 }
  0x11   :  { %16 = vsyncpa [#allocation7], 0 }
  0x12   :  { %18 = vsyncpa [#allocation7 + $0x1], 0  ;;  %s980_s14 = smov 0   ;;  %s982_s0 = smov 0  }
  0x13   :  { %s984_s15 = smov 0   ;;  %s986_s16 = smov 0  }
  0x14 LB: > { %s1001_s17 = sadd.s32 4294967295, %s952_s16   ;;  %s674_s18 = sadd.s32 4294967294, %s952_s16   ;;  %s952_s16 = sphi %s986_s16, %s1229_s16   ;;  %s948_s15 = sphi %s984_s15, %s1228_s15   ;;  %s944_s0 = sphi %s982_s0, %s1227_s0   ;;  %s940_s14 = sphi %s980_s14, %s1226_s14  }
  0x15   : > { %s1005_s19 = sadd.s32 1, %s952_s16   ;;  %s31_s20 = sadd.s32 1, %s948_s15 }
  0x16   : > { %s28_s21 = ssub.s32 %s952_s16, %s1005_s19  ;;  %p38_p5 = scmp.ne.s32.totalorder %s948_s15, %s944_s0 }
  0x17   : > { %p29_p6 = scmp.eq.s32.totalorder %s28_s21, 0  ;;  %p39_p7 = scmp.eq.s32.totalorder %s952_s16, 0 }
  0x18   : > { %p44_p8 = scmp.ne.s32.totalorder %s944_s0, %s940_s14  ;;  %p45_p9 = scmp.eq.s32.totalorder %s1001_s17, 0 }
  0x19   : > { %s1017_s22 = scalar_select %p29_p6, %s948_s15, %s31_s20  }
  0x1a   : > { %p1019_p10 = por %p39_p7, %p38_p5  ;;  %p1023_p11 = por %p45_p9, %p44_p8 }
  0x1b   : > { %p68_p12 = scmp.eq.s32.totalorder %s1001_s17, 1  ;;  %p74_p13 = scmp.eq.s32.totalorder %s674_s18, 1 }
  0x1c   : > { %p802_p1 = scmp.lt.s32.totalorder %s952_s16, 2  ;;  %s94_s27 = sand.u32 1, %s948_s15  }
  0x1d   : > { %p1030_p2 = por %p68_p12, %p38_p5  ;;  %p1034_p3 = por %p74_p13, %p44_p8 }
  0x1e   : > { %s728_s28 = sshll.u32 %s952_s16, 10  ;;  %s677_s29 = sshll.u32 %s94_s27, 6 }
  0x1f   : > { %s1218_s25 = scalar_select %p1030_p2, 1, 0 }
  0x20   : > { %s1219_s26 = scalar_select %p1034_p3, 1, 0 }
  0x21   : > { %s1043_s4 = scalar_lea.hbm %s1213_s1, %s728_s28  ;;  %s98_s5 = scalar_lea.vmem [#allocation5], %s677_s29 }
  0x22   : > { %s105_s6 = sshll.u32 %s98_s5, 4  ;;  %p1047_p4 = pnand %p802_p1, %p1019_p10  ;;  %s1051_s6 = int_to_ptr.vmem [resolvable:$true] %s105_s6 }
  0x23   : > { %s1053_s8 = scalar_lea.sflag [#allocation6], %s94_s27  ;;  %s854_s9 = scalar_lea.hbm %s1043_s4, 1024 }
  0x24   : > { %p855_p5 = scmp.ne.s32.totalorder %s1043_s4, %s854_s9  ;;  %p856_p6 = pneg %p1047_p4 }
  0x25   : > { %s859_s12 = scalar_lea.hbm %s1213_s1, 2048  ;;  %p860_p9 = scmp.lt.u32.totalorder %s1043_s4, %s1213_s1 }
  0x26   : > { %p857_p7 = pnand %p856_p6, %p855_p5  ;;  %p861_p10 = scmp.lt.u32.totalorder %s859_s12, %s854_s9 }
  0x27   : > { %p863_p13 = scmp.lt.u32.totalorder %s854_s9, %s1043_s4 }
  0x28   : > { %p858_p8 = pneg %p857_p7  ;;  %p862_p12 = por %p861_p10, %p860_p9 }
  0x2a   : > { %p864_p1 = por %p863_p13, %p862_p12 }
  0x2c   : > { %p865_p0 = pnand %p864_p1, %p858_p8 }
  0x2e   : > { %868 = shalt.err (!%p865_p0)
}
  0x2f   : > { %s869_s20 = scalar_lea.vmem %s1051_s6, 1024  ;;  %s955_s21 = smov [#allocation5]  }
  0x30   : > { %p870_p5 = scmp.ne.s32.totalorder %s1051_s6, %s869_s20  ;;  %s874_s23 = sshll.u32 %s955_s21, 4  ;;  %s875_s23 = int_to_ptr.vmem [resolvable:$false] %s874_s23 }
  0x31   : > { %s876_s27 = scalar_lea.vmem %s875_s23, 2048  ;;  %p877_p2 = scmp.lt.s32.totalorder %s1051_s6, %s875_s23 }
  0x32   : > { %p872_p7 = pnand %p870_p5, %p856_p6  ;;  %p878_p9 = scmp.lt.s32.totalorder %s876_s27, %s869_s20 }
  0x34   : > { %p873_p3 = pneg %p872_p7  ;;  %p879_p10 = por %p878_p9, %p877_p2 }
  0x36   : > { %p880_p12 = pnand %p879_p10, %p873_p3 }
  0x38   : > { %883 = shalt.err (!%p880_p12)
}
  0x39   : > { %s956_s28 = smov 128   ;;  %s957_s29 = smov 8  }
  0x3a   : > { %797 = dma.hbm_to_vmem [thread:$0]  (!%p1047_p4), %s1043_s4, 1024, %s1051_s6, %s1053_s8, %s956_s28, %s956_s28, %s957_s29  }
  0x3b   : > { %p680_p0 = scmp.ge.s32.totalorder %s952_s16, 1  ;;  %p113_p6 = scmp.lt.s32.totalorder %s952_s16, 3 }
  0x3d   : > { %p114_p8 = pnand %p680_p0, %p113_p6 }
  0x3e   : > { %s1084_s30 = sand.u32 (!%p114_p8), 1, %s944_s0  }
  0x3f   : > { %117 = sbr.rel (%p114_p8) target bundleno = 324 (0x144), region = 24  ;;  %s681_s3 = sshll.u32 (!%p114_p8), %s1084_s30, 6 }
  0x40   : > { %s120_s5 = scalar_lea.sflag (!%p114_p8), [#allocation6], %s1084_s30  ;;  %s1090_s9 = scalar_lea.vmem (!%p114_p8), [#allocation5], %s681_s3 }
  0x46   : > { %931 = dma.done.wait (%p1023_p11), %s120_s5, 1024  }
  0x47   : > { %933 = vsyncadd (%p1023_p11), %s120_s5, 4294966272  ;;  %v142_v0 = vlaneseq  ;;  %s683_s4 = sshll.u32 %s1001_s17, 1  ;;  %vm170_vm0 = vcmask 130048   ;;  %v164_v5 = vld [vmem:[%s1090_s9] sm:$0xff]  ;;  %v165_v6 = vld [vmem:[%s1090_s9 + $0x8] sm:$0xff]  ;;  %vm176_vm1 = vcmask 125952  }
  0x48   : > { %s148_s6 = sld [smem:[#allocation4 + %s683_s4]]  ;;  %s149_s7 = sadd.s32 1, %s683_s4  ;;  %v687_v7 = vld [vmem:[%s1090_s9 + $0x10] sm:$0xff]  ;;  %178 = vst.msk [vmem:[#allocation2 + $0x8] sm:$0xff] %vm170_vm0, %v164_v5  ;;  %179 = vst.msk [vmem:[#allocation2 + $0x10] sm:$0xff] %vm170_vm0, %v165_v6  ;;  %v688_v11 = vld [vmem:[%s1090_s9 + $0x18] sm:$0xff] }
  0x49   : > { %v143_v1 = vshrl.u32 %v142_v0, 7  ;;  %v146_v4 = vand.u32 127, %v142_v0  ;;  %s1100_s24 = sld [smem:[#allocation4 + %s149_s7]]  ;;  %194 = vst.msk [vmem:[#allocation2 + $0x28] sm:$0xff] %vm170_vm0, %v687_v7  ;;  %v689_v13 = vld [vmem:[%s1090_s9 + $0x20] sm:$0xff]  ;;  %v690_v14 = vld [vmem:[%s1090_s9 + $0x28] sm:$0xff] }
  0x4a   : > { %195 = vst.msk [vmem:[#allocation2 + $0x30] sm:$0xff] %vm170_vm0, %v688_v11  ;;  %210 = vst.msk [vmem:[#allocation2 + $0x48] sm:$0xff] %vm170_vm0, %v689_v13  ;;  %v691_v19 = vld [vmem:[%s1090_s9 + $0x30] sm:$0xff]  ;;  %v692_v20 = vld [vmem:[%s1090_s9 + $0x38] sm:$0xff]  ;;  %v958_v27 = vmov 1.0|1.0  }
  0x4b   : > { %v168_v2 = vsub.s32 0, %v143_v1  ;;  %v174_v3 = vsub.s32 7, %v143_v1  ;;  %211 = vst.msk [vmem:[#allocation2 + $0x50] sm:$0xff] %vm170_vm0, %v690_v14  ;;  %226 = vst.msk [vmem:[#allocation2 + $0x68] sm:$0xff] %vm170_vm0, %v691_v19  ;;  %v144_v23 = vadd.s32 8, %v143_v1  ;;  %s141_s11 = scalar_lea.vmem [#allocation8], %s681_s3 }
  0x4c   : > { %227 = vst.msk [vmem:[#allocation2 + $0x70] sm:$0xff] %vm170_vm0, %v692_v20  ;;  %s593_s12 = sshll.u32 %s141_s11, 4  ;;  %s729_s13 = sshll.u32 %s1001_s17, 10  ;;  %s1157_s12 = int_to_ptr.vmem [resolvable:$true] %s593_s12 }
  0x4d   : > { %v169_v9 = vrot.slane %v164_v5, %v168_v2  ;;  %v175_v10 = vrot.slane %v165_v6, %v174_v3  ;;  %v186_v12 = vrot.slane %v687_v7, %v168_v2  ;;  %v192_v16 = vrot.slane %v688_v11, %v174_v3  ;;  %s1164_s17 = scalar_lea.hbm %s1214_s2, %s729_s13  ;;  %s580_s21 = scalar_lea.sflag [#allocation7], %s1084_s30 }
  0x4e   : > { %s684_s8 = sadd.s32 4294967292, %s148_s6  ;;  %v202_v17 = vrot.slane %v689_v13, %v168_v2  ;;  %v208_v18 = vrot.slane %v690_v14, %v174_v3  ;;  %v218_v21 = vrot.slane %v691_v19, %v168_v2  ;;  %v224_v22 = vrot.slane %v692_v20, %v174_v3  ;;  %s884_s23 = scalar_lea.vmem %s1157_s12, 1024 }
  0x4f   : > { %v152_v8 = vstv %s684_s8  ;;  %171 = vst.msk [vmem:[#allocation2] sm:$0xff] %vm170_vm0, %v169_v9  ;;  %188 = vst.msk [vmem:[#allocation2 + $0x20] sm:$0xff] %vm170_vm0, %v186_v12  ;;  %s634_s10 = scalar_lea.vmem [#allocation2], %s1100_s24  ;;  %p885_p11 = scmp.ne.s32.totalorder %s1157_s12, %s884_s23 }
  0x50   : > { %v153_v15 = vadd.s32 %v152_v8, %v146_v4  ;;  %177 = vst.msk [vmem:[#allocation2 + $0x18] sm:$0xf] %vm176_vm1, %v175_v10  ;;  %193 = vst.msk [vmem:[#allocation2 + $0x38] sm:$0xf] %vm176_vm1, %v192_v16  ;;  %p1223_p2 = scmp.ne.s32.totalorder %s1218_s25, 0  ;;  %s959_s27 = smov [#allocation8]  }
  0x51   : > { %204 = vst.msk [vmem:[#allocation2 + $0x40] sm:$0xff] %vm170_vm0, %v202_v17  ;;  %220 = vst.msk [vmem:[#allocation2 + $0x60] sm:$0xff] %vm170_vm0, %v218_v21  ;;  %s888_s28 = sshll.u32 %s959_s27, 4  ;;  %s889_s28 = int_to_ptr.vmem [resolvable:$false] %s888_s28 }
  0x52   : > { %vm154_vm2 = vcmp.gt.s32.totalorder %v153_v15, 0  ;;  %209 = vst.msk [vmem:[#allocation2 + $0x58] sm:$0xf] %vm176_vm1, %v208_v18  ;;  %225 = vst.msk [vmem:[#allocation2 + $0x78] sm:$0xf] %vm176_vm1, %v224_v22  ;;  %p886_p3 = pnand %p885_p11, %p1223_p2  ;;  %s890_s29 = scalar_lea.vmem %s889_s28, 2048 }
  0x53   : > { %v155_v24 = vsel %vm154_vm2, %v153_v15, 0  ;;  %p891_p13 = scmp.lt.s32.totalorder %s1157_s12, %s889_s28  ;;  %p892_p1 = scmp.lt.s32.totalorder %s890_s29, %s884_s23 }
  0x54   : > { %vm156_vm3 = vcmp.lt.s32.totalorder %v155_v24, 15  ;;  %p887_p4 = pneg %p886_p3 }
  0x55   : > { %v157_v25 = vsel %vm156_vm3, %v155_v24, 15  ;;  %p893_p5 = por %p892_p1, %p891_p13 }
  0x56   : > { %vm158_vm4 = vcmp.eq.s32.totalorder %v143_v1, %v157_v25  ;;  %vm159_vm5 = vcmp.eq.s32.totalorder %v144_v23, %v157_v25 }
  0x57   : > { %vm1123_vm6 = vmpackc.low %vm159_vm5, %vm158_vm4  ;;  %p894_p7 = pnand %p893_p5, %p887_p4 }
  0x58   : > { %775 = vmatprep.subr.msk.bf16.mxu0 %vm1123_vm6, %v958_v27  ;;  %779 = vmatprep.subr.msk.bf16.mxu1 %vm1123_vm6, %v958_v27 }
  0x59   : > { %777 = vmatpush3.bf16.msk.msra.mxu0 %vm1123_vm6, %v958_v27  ;;  %781 = vmatpush3.bf16.msk.msra.mxu1 %vm1123_vm6, %v958_v27  ;;  %v693_v28 = vld [vmem:[%s634_s10 + $0x4] sm:$0xff]  ;;  %v694_v30 = vld [vmem:[%s634_s10 + $0xc] sm:$0xff] }
  0x5a   : > { %v699_v29 = vld [vmem:[%s634_s10 + $0x24] sm:$0xff]  ;;  %783 = vmatprep.subr.msk.bf16.mxu0 %vm1123_vm6, %v958_v27  ;;  %787 = vmatprep.subr.msk.bf16.mxu1 %vm1123_vm6, %v958_v27  ;;  %v700_v31 = vld [vmem:[%s634_s10 + $0x2c] sm:$0xff] }
  0x5b   : > { %750 = vmatprep.mubr.msk.f32.mxu0 %vm170_vm0, %v693_v28  ;;  %757 = vmatprep.mubr.msk.f32.mxu1 %vm170_vm0, %v699_v29  ;;  %v707_v32 = vld [vmem:[%s634_s10 + $0x44] sm:$0xff]  ;;  %v708_v34 = vld [vmem:[%s634_s10 + $0x4c] sm:$0xff] }
  0x5c   : > { %v715_v33 = vld [vmem:[%s634_s10 + $0x64] sm:$0xff]  ;;  %751 = vmatmul.mubr.msk.f32.vlgmr.msra.gmra.mrb[0].mxu0 %vm170_vm0, %v694_v30  ;;  %758 = vmatmul.mubr.msk.f32.vlgmr.msra.gmra.mrb[0].mxu1 %vm170_vm0, %v700_v31  ;;  %v716_v35 = vld [vmem:[%s634_s10 + $0x6c] sm:$0xff] }
  0x5d   : > { %785 = vmatpush3.bf16.msk.msra.mxu0 %vm1123_vm6, %v958_v27  ;;  %789 = vmatpush3.bf16.msk.msra.mxu1 %vm1123_vm6, %v958_v27 }
  0x5e   : > { %764 = vmatprep.mubr.msk.f32.mxu0 %vm170_vm0, %v707_v32  ;;  %771 = vmatprep.mubr.msk.f32.mxu1 %vm170_vm0, %v715_v33 }
  0x60   : > { %765 = vmatmul.mubr.msk.f32.vlgmr.msra.gmra.mrb[2].mxu0 %vm170_vm0, %v708_v34  ;;  %772 = vmatmul.mubr.msk.f32.vlgmr.msra.gmra.mrb[2].mxu1 %vm170_vm0, %v716_v35 }
 0x12f   : > { %v752_v36 = vpop.f32.mrb[0].mxu0  ;;  %v759_v37 = vpop.f32.mrb[0].mxu1 }
 0x130   : > { %314 = vst.msk [vmem:[%s141_s11 + $0x8] sm:$0xff] %vm170_vm0, %v752_v36  ;;  %706 = vst.msk [vmem:[%s141_s11 + $0x18] sm:$0xff] %vm170_vm0, %v759_v37  ;;  %v304_v38 = vpop.f32.mrb[1].mxu0  ;;  %v391_v39 = vpop.f32.mrb[1].mxu1 }
 0x131   : > { %313 = vst.msk [vmem:[%s141_s11] sm:$0xff] %vm170_vm0, %v304_v38  ;;  %705 = vst.msk [vmem:[%s141_s11 + $0x10] sm:$0xff] %vm170_vm0, %v391_v39 }
 0x133   : > { %v766_v40 = vpop.f32.mrb[2].mxu0  ;;  %v773_v41 = vpop.f32.mrb[2].mxu1 }
 0x134   : > { %714 = vst.msk [vmem:[%s141_s11 + $0x28] sm:$0xff] %vm170_vm0, %v766_v40  ;;  %722 = vst.msk [vmem:[%s141_s11 + $0x38] sm:$0xff] %vm170_vm0, %v773_v41  ;;  %v479_v42 = vpop.f32.mrb[3].mxu0  ;;  %v567_v43 = vpop.f32.mrb[3].mxu1 }
 0x135   : > { %713 = vst.msk [vmem:[%s141_s11 + $0x20] sm:$0xff] %vm170_vm0, %v479_v42  ;;  %721 = vst.msk [vmem:[%s141_s11 + $0x30] sm:$0xff] %vm170_vm0, %v567_v43 }
 0x136   : > { %897 = shalt.err (!%p894_p7)
}
 0x137   : > { %s898_s3 = scalar_lea.hbm %s1164_s17, 1024  ;;  %s902_s4 = scalar_lea.hbm %s1214_s2, 2048 }
 0x138   : > { %p899_p9 = scmp.ne.s32.totalorder %s1164_s17, %s898_s3  ;;  %p903_p0 = scmp.lt.u32.totalorder %s1164_s17, %s1214_s2 }
 0x139   : > { %p904_p6 = scmp.lt.u32.totalorder %s902_s4, %s898_s3  ;;  %p906_p11 = scmp.lt.u32.totalorder %s898_s3, %s1164_s17 }
 0x13a   : > { %p900_p10 = pnand %p899_p9, %p1223_p2 }
 0x13b   : > { %p905_p8 = por %p904_p6, %p903_p0 }
 0x13c   : > { %p901_p12 = pneg %p900_p10 }
 0x13d   : > { %p907_p3 = por %p906_p11, %p905_p8 }
 0x13f   : > { %p908_p4 = pnand %p907_p3, %p901_p12 }
 0x141   : > { %911 = shalt.err (!%p908_p4)
}
 0x142   : > { %s960_s8 = smov 128   ;;  %s961_s24 = smov 8  }
 0x143   : > { %792 = dma.vmem_to_hbm [thread:$0]  (%p1223_p2), %s1157_s12, 1024, %s1164_s17, %s580_s21, %s960_s8, %s960_s8, %s961_s24  }
 0x144 PF: > { %s608_s10 = sand.u32 1, %s940_s14   ;;  %p1224_p13 = scmp.ne.s32.totalorder %s1219_s26, 0 }
 0x145   : > { %p1225_p1 = scmp.ge.s32.totalorder %s952_s16, 2  ;;  %s609_s11 = scalar_lea.sflag [#allocation7], %s608_s10 }
 0x147   : > { %p799_p5 = pnand %p1225_p1, %p1224_p13 }
 0x149   : > { %935 = dma.done.wait (!%p799_p5), %s609_s11, 1024  }
 0x14a   : > { %937 = vsyncadd (!%p799_p5), %s609_s11, 4294966272  ;;  %p21_p7 = scmp.ge.s32.totalorder %s1005_s19, 4   ;;  %s1226_s14 = smov %s944_s0 }
 0x14b   : > { %s1227_s0 = smov %s948_s15  ;;  %s1228_s15 = smov %s1017_s22 }
 0x14c   : > { %s1229_s16 = smov %s1005_s19  ;;  %23 = sbr.rel (!%p21_p7) target bundleno = 20 (0x14), region = 82 }
 0x153   :  { %614 = vsyncpa [#allocation6], 1 }
 0x154   :  { %616 = vsyncpa [#allocation6 + $0x1], 1 }
 0x155   :  { %617 = vsyncpa [#allocation7], 1 }
 0x156   :  { %619 = vsyncpa [#allocation7 + $0x1], 1 }

// kernel: _aug_matmul.1
= control target key start
LH: loop header
LB: loop body
LE: loop exit
PB: predicated region body
PF: predicated region fallthrough
CT: control target
= control target key end

     0   :  { %s1514_s0 = inlined_call_operand.vmem [shape: s32[4], index: 0, kind: input, shape index: {}]   ;;  %s1515_s1 = inlined_call_operand.hbm [shape: f32[2,4,16,16], index: 1, kind: input, shape index: {}]   ;;  %s1516_s2 = inlined_call_operand.hbm [shape: f32[2,4,16,16], index: 2, kind: output, shape index: {}]  }
   0x1   :  { %s7_s11 = sshll.u32 %s1514_s0, 4  ;;  %s8_s11 = int_to_ptr.vmem [resolvable:$true] %s7_s11 }
   0x2   :  { %s1154_s12 = scalar_lea.vmem %s8_s11, 16  ;;  %p1159_p1 = scmp.lt.s32.totalorder %s8_s11, %s8_s11 }
   0x3   :  { %p1155_p0 = scmp.ne.s32.totalorder %s8_s11, %s1154_s12  ;;  %p1160_p2 = scmp.lt.s32.totalorder %s1154_s12, %s1154_s12 }
   0x5   :  { %p1161_p3 = por %p1160_p2, %p1159_p1 }
   0x7   :  { %p1162_p4 = pnand %p1161_p3, %p1155_p0 }
   0x9   :  { %1165 = shalt.err (!%p1162_p4)  }
   0xa   :  { %s1266_s13 = smov [#allocation3]  }
   0xb   :  { %10 = dma.vmem_to_smem %s8_s11, 16, %s1266_s13, [#allocation2] }
   0xc   :  { %1240 = dma.done.wait [#allocation2], 16 }
   0xd   :  { %1241 = vsyncadd [#allocation2], 4294967280 }
   0xe   :  { %12 = sfence }
   0xf   :  { %13 = vsyncpa [#allocation5], 0 }
  0x10   :  { %15 = vsyncpa [#allocation5 + $0x1], 0 }
  0x11   :  { %16 = vsyncpa [#allocation6], 0 }
  0x12   :  { %18 = vsyncpa [#allocation6 + $0x1], 0  ;;  %s1293_s14 = smov 0   ;;  %s1295_s0 = smov 0  }
  0x13   :  { %s1297_s15 = smov 0   ;;  %s1299_s16 = smov 0  }
  0x14 LB: > { %s1314_s17 = sadd.s32 4294967295, %s1264_s16   ;;  %s922_s18 = sadd.s32 4294967294, %s1264_s16   ;;  %s1264_s16 = sphi %s1299_s16, %s1531_s16   ;;  %s1260_s15 = sphi %s1297_s15, %s1530_s15   ;;  %s1256_s0 = sphi %s1295_s0, %s1529_s0   ;;  %s1252_s14 = sphi %s1293_s14, %s1528_s14  }
  0x15   : > { %s1318_s19 = sadd.s32 1, %s1264_s16   ;;  %s31_s20 = sadd.s32 1, %s1260_s15 }
  0x16   : > { %s28_s21 = ssub.s32 %s1264_s16, %s1318_s19  ;;  %p38_p5 = scmp.ne.s32.totalorder %s1260_s15, %s1256_s0 }
  0x17   : > { %p29_p6 = scmp.eq.s32.totalorder %s28_s21, 0  ;;  %p39_p7 = scmp.eq.s32.totalorder %s1264_s16, 0 }
  0x18   : > { %p44_p8 = scmp.ne.s32.totalorder %s1256_s0, %s1252_s14  ;;  %p45_p9 = scmp.eq.s32.totalorder %s1314_s17, 0 }
  0x19   : > { %s1330_s22 = scalar_select %p29_p6, %s1260_s15, %s31_s20  }
  0x1a   : > { %p1332_p10 = por %p39_p7, %p38_p5  ;;  %p1336_p11 = por %p45_p9, %p44_p8 }
  0x1b   : > { %p68_p12 = scmp.eq.s32.totalorder %s1314_s17, 1  ;;  %p74_p13 = scmp.eq.s32.totalorder %s922_s18, 1 }
  0x1c   : > { %p1113_p1 = scmp.lt.s32.totalorder %s1264_s16, 2  ;;  %s94_s27 = sand.u32 1, %s1260_s15  }
  0x1d   : > { %p1343_p2 = por %p68_p12, %p38_p5  ;;  %p1347_p3 = por %p74_p13, %p44_p8 }
  0x1e   : > { %s979_s28 = sshll.u32 %s1264_s16, 10  ;;  %s925_s29 = sshll.u32 %s94_s27, 6 }
  0x1f   : > { %s1520_s25 = scalar_select %p1343_p2, 1, 0 }
  0x20   : > { %s1521_s26 = scalar_select %p1347_p3, 1, 0 }
  0x21   : > { %s1356_s4 = scalar_lea.hbm %s1515_s1, %s979_s28  ;;  %s98_s5 = scalar_lea.vmem [#allocation4], %s925_s29 }
  0x22   : > { %s105_s6 = sshll.u32 %s98_s5, 4  ;;  %p1360_p4 = pnand %p1113_p1, %p1332_p10  ;;  %s1364_s6 = int_to_ptr.vmem [resolvable:$true] %s105_s6 }
  0x23   : > { %s1366_s8 = scalar_lea.sflag [#allocation5], %s94_s27  ;;  %s1166_s9 = scalar_lea.hbm %s1356_s4, 1024 }
  0x24   : > { %p1167_p5 = scmp.ne.s32.totalorder %s1356_s4, %s1166_s9  ;;  %p1168_p6 = pneg %p1360_p4 }
  0x25   : > { %s1171_s12 = scalar_lea.hbm %s1515_s1, 2048  ;;  %p1172_p9 = scmp.lt.u32.totalorder %s1356_s4, %s1515_s1 }
  0x26   : > { %p1169_p7 = pnand %p1168_p6, %p1167_p5  ;;  %p1173_p10 = scmp.lt.u32.totalorder %s1171_s12, %s1166_s9 }
  0x27   : > { %p1175_p13 = scmp.lt.u32.totalorder %s1166_s9, %s1356_s4 }
  0x28   : > { %p1170_p8 = pneg %p1169_p7  ;;  %p1174_p12 = por %p1173_p10, %p1172_p9 }
  0x2a   : > { %p1176_p1 = por %p1175_p13, %p1174_p12 }
  0x2c   : > { %p1177_p0 = pnand %p1176_p1, %p1170_p8 }
  0x2e   : > { %1180 = shalt.err (!%p1177_p0)
}
  0x2f   : > { %s1181_s20 = scalar_lea.vmem %s1364_s6, 1024  ;;  %s1267_s21 = smov [#allocation4]  }
  0x30   : > { %p1182_p5 = scmp.ne.s32.totalorder %s1364_s6, %s1181_s20  ;;  %s1186_s23 = sshll.u32 %s1267_s21, 4  ;;  %s1187_s23 = int_to_ptr.vmem [resolvable:$false] %s1186_s23 }
  0x31   : > { %s1188_s27 = scalar_lea.vmem %s1187_s23, 2048  ;;  %p1189_p2 = scmp.lt.s32.totalorder %s1364_s6, %s1187_s23 }
  0x32   : > { %p1184_p7 = pnand %p1182_p5, %p1168_p6  ;;  %p1190_p9 = scmp.lt.s32.totalorder %s1188_s27, %s1181_s20 }
  0x34   : > { %p1185_p3 = pneg %p1184_p7  ;;  %p1191_p10 = por %p1190_p9, %p1189_p2 }
  0x36   : > { %p1192_p12 = pnand %p1191_p10, %p1185_p3 }
  0x38   : > { %1195 = shalt.err (!%p1192_p12)
}
  0x39   : > { %s1268_s28 = smov 128   ;;  %s1269_s29 = smov 8  }
  0x3a   : > { %1108 = dma.hbm_to_vmem [thread:$0]  (!%p1360_p4), %s1356_s4, 1024, %s1364_s6, %s1366_s8, %s1268_s28, %s1268_s28, %s1269_s29  }
  0x3b   : > { %p928_p0 = scmp.ge.s32.totalorder %s1264_s16, 1  ;;  %p113_p6 = scmp.lt.s32.totalorder %s1264_s16, 3 }
  0x3d   : > { %p114_p8 = pnand %p928_p0, %p113_p6 }
  0x3e   : > { %s1397_s30 = sand.u32 (!%p114_p8), 1, %s1256_s0  }
  0x3f   : > { %117 = sbr.rel (%p114_p8) target bundleno = 544 (0x220), region = 24  ;;  %s929_s3 = sshll.u32 (!%p114_p8), %s1397_s30, 6 }
  0x40   : > { %s120_s5 = scalar_lea.sflag (!%p114_p8), [#allocation5], %s1397_s30  ;;  %s1403_s9 = scalar_lea.vmem (!%p114_p8), [#allocation4], %s929_s3 }
  0x46   : > { %1243 = dma.done.wait (%p1336_p11), %s120_s5, 1024  }
  0x47   : > { %1245 = vsyncadd (%p1336_p11), %s120_s5, 4294966272  ;;  %v142_v0 = vlaneseq  ;;  %s931_s4 = sshll.u32 %s1314_s17, 1  ;;  %v182_v3 = vld [vmem:[%s1403_s9] sm:$0xff]  ;;  %v183_v4 = vld [vmem:[%s1403_s9 + $0x8] sm:$0xff]  ;;  %vm184_vm5 = vcmask 130048   ;;  %v1270_v24 = vmov 0.0  }
  0x48   : > { %s148_s6 = sld [smem:[#allocation3 + %s931_s4]]  ;;  %s149_s7 = sadd.s32 1, %s931_s4  ;;  %v944_v6 = vld [vmem:[%s1403_s9 + $0x10] sm:$0xff]  ;;  %v1069_v7 = vpack.c.bf16 %v183_v4, %v182_v3  ;;  %v945_v9 = vld [vmem:[%s1403_s9 + $0x18] sm:$0xff]  ;;  %v954_v19 = vld [vmem:[%s1403_s9 + $0x20] sm:$0xff] }
  0x49   : > { %v143_v1 = vshrl.u32 %v142_v0, 7  ;;  %s150_s8 = sld [smem:[#allocation3 + %s149_s7]]  ;;  %v146_v5 = vand.u32 127, %v142_v0  ;;  %v1077_v12 = vpack.c.bf16 %v945_v9, %v944_v6  ;;  %v955_v20 = vld [vmem:[%s1403_s9 + $0x28] sm:$0xff]  ;;  %v1271_v28 = vmov 1.0|1.0  }
  0x4a   : > { %1070 = vmatprep.subr.bf16.mxu0 %v1069_v7  ;;  %v1085_v27 = vpack.c.bf16 %v955_v20, %v954_v19  ;;  %v964_v29 = vld [vmem:[%s1403_s9 + $0x30] sm:$0xff]  ;;  %v965_v30 = vld [vmem:[%s1403_s9 + $0x38] sm:$0xff]  ;;  %s141_s11 = scalar_lea.vmem [#allocation7], %s929_s3  ;;  %s980_s13 = sshll.u32 %s1314_s17, 10 }
  0x4b   : > { %v144_v2 = vadd.s32 8, %v143_v1  ;;  %1072 = vmatpush3.bf16.msra.mxu0 %v1069_v7  ;;  %v1093_v31 = vpack.c.bf16 %v965_v30, %v964_v29  ;;  %s849_s12 = sshll.u32 %s141_s11, 4  ;;  %s1468_s21 = scalar_lea.hbm %s1516_s2, %s980_s13  ;;  %s1462_s12 = int_to_ptr.vmem [resolvable:$true] %s849_s12 }
  0x4c   : > { %1078 = vmatprep.subr.bf16.mxu0 %v1077_v12  ;;  %s836_s17 = scalar_lea.sflag [#allocation6], %s1397_s30  ;;  %s1196_s23 = scalar_lea.vmem %s1462_s12, 1024 }
  0x4d   : > { %p1197_p11 = scmp.ne.s32.totalorder %s1462_s12, %s1196_s23  ;;  %p1525_p2 = scmp.ne.s32.totalorder %s1520_s25, 0 }
  0x4e   : > { %s935_s10 = sadd.s32 4294967292, %s148_s6  ;;  %s1272_s27 = smov [#allocation7]  }
  0x4f   : > { %s932_s24 = sadd.s32 4294967292, %s150_s8  ;;  %v170_v8 = vstv %s935_s10  ;;  %p1198_p3 = pnand %p1197_p11, %p1525_p2 }
  0x50   : > { %v152_v10 = vstv %s932_s24  ;;  %v171_v11 = vadd.s32 %v170_v8, %v146_v5  ;;  %s1200_s28 = sshll.u32 %s1272_s27, 4  ;;  %s1201_s28 = int_to_ptr.vmem [resolvable:$false] %s1200_s28 }
  0x51   : > { %v153_v13 = vadd.s32 %v152_v10, %v143_v1  ;;  %v154_v14 = vadd.s32 %v152_v10, %v144_v2  ;;  %p1199_p4 = pneg %p1198_p3  ;;  %s1202_s29 = scalar_lea.vmem %s1201_s28, 2048 }
  0x52   : > { %vm172_vm0 = vcmp.gt.s32.totalorder %v171_v11, 0  ;;  %p1203_p13 = scmp.lt.s32.totalorder %s1462_s12, %s1201_s28  ;;  %p1204_p1 = scmp.lt.s32.totalorder %s1202_s29, %s1196_s23 }
  0x53   : > { %vm155_vm1 = vcmp.gt.s32.totalorder %v153_v13, 0  ;;  %vm157_vm2 = vcmp.gt.s32.totalorder %v154_v14, 0  ;;  %v173_v15 = vsel %vm172_vm0, %v171_v11, 0 }
  0x54   : > { %v156_v16 = vsel %vm155_vm1, %v153_v13, 0  ;;  %v158_v17 = vsel %vm157_vm2, %v154_v14, 0  ;;  %vm174_vm3 = vcmp.lt.s32.totalorder %v173_v15, 15  ;;  %p1205_p5 = por %p1204_p1, %p1203_p13 }
  0x55   : > { %vm159_vm4 = vcmp.lt.s32.totalorder %v156_v16, 15  ;;  %vm161_vm6 = vcmp.lt.s32.totalorder %v158_v17, 15  ;;  %v175_v18 = vsel %vm174_vm3, %v173_v15, 15 }
  0x56   : > { %v160_v21 = vsel %vm159_vm4, %v156_v16, 15  ;;  %v162_v22 = vsel %vm161_vm6, %v158_v17, 15  ;;  %vm176_vm7 = vcmp.eq.s32.totalorder %v143_v1, %v175_v18  ;;  %vm177_vm8 = vcmp.eq.s32.totalorder %v144_v2, %v175_v18  ;;  %p1206_p7 = pnand %p1205_p5, %p1199_p4 }
  0x57   : > { %vm163_vm9 = vcmp.eq.s32.totalorder %v146_v5, %v160_v21  ;;  %vm164_vm10 = vcmp.eq.s32.totalorder %v146_v5, %v162_v22  ;;  %vm1416_vm11 = vmpackc.low %vm177_vm8, %vm176_vm7 }
  0x58   : > { %v933_v25 = vsel %vm163_vm9, 1.0, %v1270_v24  ;;  %v934_v26 = vsel %vm164_vm10, 1.0, %v1270_v24  ;;  %1074 = vmatprep.subr.msk.bf16.mxu1 %vm1416_vm11, %v1271_v28 }
  0x59   : > { %1017 = vmatprep.mubr.msk.f32.mxu0 %vm184_vm5, %v933_v25  ;;  %1076 = vmatpush3.bf16.msk.msra.mxu1 %vm1416_vm11, %v1271_v28 }
  0x5a   : > { %1018 = vmatmul.mubr.msk.f32.vlgmr.msra.gmra.mrb[0].mxu0 %vm184_vm5, %v934_v26  ;;  %1082 = vmatprep.subr.msk.bf16.mxu1 %vm1416_vm11, %v1271_v28 }
  0x5b   : > { %1080 = vmatpush3.bf16.msra.mxu0 %v1077_v12  ;;  %1031 = vmatprep.mubr.msk.f32.mxu0 %vm184_vm5, %v933_v25 }
  0x5c   : > { %1086 = vmatprep.subr.bf16.mxu0 %v1085_v27 }
  0x5e   : > { %1032 = vmatmul.mubr.msk.f32.vlgmr.msra.gmra.mrb[2].mxu0 %vm184_vm5, %v934_v26 }
  0x5f   : > { %1088 = vmatpush3.bf16.msra.mxu0 %v1085_v27  ;;  %1045 = vmatprep.mubr.msk.f32.mxu0 %vm184_vm5, %v933_v25 }
  0x60   : > { %1094 = vmatprep.subr.bf16.mxu0 %v1093_v31 }
  0x62   : > { %1046 = vmatmul.mubr.msk.f32.vlgmr.msra.gmra.mrb[4].mxu0 %vm184_vm5, %v934_v26 }
  0x63   : > { %1096 = vmatpush3.bf16.msra.mxu0 %v1093_v31  ;;  %1059 = vmatprep.mubr.msk.f32.mxu0 %vm184_vm5, %v933_v25 }
  0x66   : > { %1060 = vmatmul.mubr.msk.f32.vlgmr.msra.gmra.mrb[6].mxu0 %vm184_vm5, %v934_v26 }
 0x12d   : > { %v1019_v32 = vpop.f32.mrb[0].mxu0 }
 0x12e   : > { %v257_v33 = vpop.f32.mrb[1].mxu0 }
 0x12f   : > { %1024 = vmatprep.mubr.msk.f32.mxu1 %vm184_vm5, %v257_v33 }
 0x130   : > { %1025 = vmatmul.mubr.msk.f32.vlgmr.msra.gmra.mrb[0].mxu1 %vm184_vm5, %v1019_v32 }
 0x131   : > { %1084 = vmatpush3.bf16.msk.msra.mxu1 %vm1416_vm11, %v1271_v28  ;;  %v1033_v34 = vpop.f32.mrb[2].mxu0 }
 0x132   : > { %v418_v35 = vpop.f32.mrb[3].mxu0  ;;  %1090 = vmatprep.subr.msk.bf16.mxu1 %vm1416_vm11, %v1271_v28 }
 0x133   : > { %1038 = vmatprep.mubr.msk.f32.mxu1 %vm184_vm5, %v418_v35 }
 0x134   : > { %1039 = vmatmul.mubr.msk.f32.vlgmr.msra.gmra.mrb[2].mxu1 %vm184_vm5, %v1033_v34 }
 0x135   : > { %1092 = vmatpush3.bf16.msk.msra.mxu1 %vm1416_vm11, %v1271_v28  ;;  %v1047_v36 = vpop.f32.mrb[4].mxu0 }
 0x136   : > { %v580_v37 = vpop.f32.mrb[5].mxu0  ;;  %1098 = vmatprep.subr.msk.bf16.mxu1 %vm1416_vm11, %v1271_v28 }
 0x137   : > { %1052 = vmatprep.mubr.msk.f32.mxu1 %vm184_vm5, %v580_v37 }
 0x138   : > { %1053 = vmatmul.mubr.msk.f32.vlgmr.msra.gmra.mrb[4].mxu1 %vm184_vm5, %v1047_v36 }
 0x139   : > { %1100 = vmatpush3.bf16.msk.msra.mxu1 %vm1416_vm11, %v1271_v28  ;;  %v1061_v38 = vpop.f32.mrb[6].mxu0 }
 0x13a   : > { %v742_v39 = vpop.f32.mrb[7].mxu0 }
 0x13b   : > { %1066 = vmatprep.mubr.msk.f32.mxu1 %vm184_vm5, %v742_v39 }
 0x13c   : > { %1067 = vmatmul.mubr.msk.f32.vlgmr.msra.gmra.mrb[6].mxu1 %vm184_vm5, %v1061_v38 }
 0x203   : > { %v1026_v40 = vpop.f32.mrb[0].mxu1 }
 0x204   : > { %348 = vst.msk [vmem:[%s141_s11 + $0x8] sm:$0xff] %vm184_vm5, %v1026_v40  ;;  %v338_v41 = vpop.f32.mrb[1].mxu1 }
 0x205   : > { %347 = vst.msk [vmem:[%s141_s11] sm:$0xff] %vm184_vm5, %v338_v41 }
 0x207   : > { %v1040_v42 = vpop.f32.mrb[2].mxu1 }
 0x208   : > { %953 = vst.msk [vmem:[%s141_s11 + $0x18] sm:$0xff] %vm184_vm5, %v1040_v42  ;;  %v499_v43 = vpop.f32.mrb[3].mxu1 }
 0x209   : > { %952 = vst.msk [vmem:[%s141_s11 + $0x10] sm:$0xff] %vm184_vm5, %v499_v43 }
 0x20b   : > { %v1054_v44 = vpop.f32.mrb[4].mxu1 }
 0x20c   : > { %963 = vst.msk [vmem:[%s141_s11 + $0x28] sm:$0xff] %vm184_vm5, %v1054_v44  ;;  %v661_v45 = vpop.f32.mrb[5].mxu1 }
 0x20d   : > { %962 = vst.msk [vmem:[%s141_s11 + $0x20] sm:$0xff] %vm184_vm5, %v661_v45 }
 0x20f   : > { %v1068_v46 = vpop.f32.mrb[6].mxu1 }
 0x210   : > { %973 = vst.msk [vmem:[%s141_s11 + $0x38] sm:$0xff] %vm184_vm5, %v1068_v46  ;;  %v823_v47 = vpop.f32.mrb[7].mxu1 }
 0x211   : > { %972 = vst.msk [vmem:[%s141_s11 + $0x30] sm:$0xff] %vm184_vm5, %v823_v47 }
 0x212   : > { %1209 = shalt.err (!%p1206_p7)
}
 0x213   : > { %s1210_s3 = scalar_lea.hbm %s1468_s21, 1024  ;;  %s1214_s4 = scalar_lea.hbm %s1516_s2, 2048 }
 0x214   : > { %p1211_p9 = scmp.ne.s32.totalorder %s1468_s21, %s1210_s3  ;;  %p1215_p0 = scmp.lt.u32.totalorder %s1468_s21, %s1516_s2 }
 0x215   : > { %p1216_p6 = scmp.lt.u32.totalorder %s1214_s4, %s1210_s3  ;;  %p1218_p11 = scmp.lt.u32.totalorder %s1210_s3, %s1468_s21 }
 0x216   : > { %p1212_p10 = pnand %p1211_p9, %p1525_p2 }
 0x217   : > { %p1217_p8 = por %p1216_p6, %p1215_p0 }
 0x218   : > { %p1213_p12 = pneg %p1212_p10 }
 0x219   : > { %p1219_p3 = por %p1218_p11, %p1217_p8 }
 0x21b   : > { %p1220_p4 = pnand %p1219_p3, %p1213_p12 }
 0x21d   : > { %1223 = shalt.err (!%p1220_p4)
}
 0x21e   : > { %s1273_s8 = smov 128   ;;  %s1274_s10 = smov 8  }
 0x21f   : > { %1103 = dma.vmem_to_hbm [thread:$0]  (%p1525_p2), %s1462_s12, 1024, %s1468_s21, %s836_s17, %s1273_s8, %s1273_s8, %s1274_s10  }
 0x220 PF: > { %s864_s24 = sand.u32 1, %s1252_s14   ;;  %p1526_p13 = scmp.ne.s32.totalorder %s1521_s26, 0 }
 0x221   : > { %p1527_p1 = scmp.ge.s32.totalorder %s1264_s16, 2  ;;  %s865_s11 = scalar_lea.sflag [#allocation6], %s864_s24 }
 0x223   : > { %p1110_p5 = pnand %p1527_p1, %p1526_p13 }
 0x225   : > { %1247 = dma.done.wait (!%p1110_p5), %s865_s11, 1024  }
 0x226   : > { %1249 = vsyncadd (!%p1110_p5), %s865_s11, 4294966272  ;;  %p21_p7 = scmp.ge.s32.totalorder %s1318_s19, 4   ;;  %s1528_s14 = smov %s1256_s0 }
 0x227   : > { %s1529_s0 = smov %s1260_s15  ;;  %s1530_s15 = smov %s1330_s22 }
 0x228   : > { %s1531_s16 = smov %s1318_s19  ;;  %23 = sbr.rel (!%p21_p7) target bundleno = 20 (0x14), region = 75 }
 0x22f   :  { %870 = vsyncpa [#allocation5], 1 }
 0x230   :  { %872 = vsyncpa [#allocation5 + $0x1], 1 }
 0x231   :  { %873 = vsyncpa [#allocation6], 1 }
 0x232   :  { %875 = vsyncpa [#allocation6 + $0x1], 1 }

</bundles_post_ra>
